<compile_context>
chip_gen: v6e
topology: v6e:2x2x1
jax: 0.10.0
libtpu: 0.0.40
codegen_flags: <defaults>
</compile_context>

<pallas_src>
import jax
import jax.numpy as jnp
from jax.experimental import pallas as pl
from jax.experimental.pallas import tpu as pltpu


def time_embedding_kernel(x_ref, w1_ref, b1_ref, w2_ref, b2_ref, o_ref):
    # x:  (Bp, E)  bf16    w1: (E, H)  bf16    b1: (1, H)   f32
    # w2: (H, tn)  bf16    b2: (1, tn) f32     o:  (Bp, tn) out dtype
    # Linear 1: bf16 x bf16 -> f32 accumulation on the MXU.
    h = jnp.dot(x_ref[...], w1_ref[...], preferred_element_type=jnp.float32)
    h = h + b1_ref[...]                       # (1, H) broadcasts over batch
    # SiLU in f32: sigmoid on the EUP, multiply on the VPU.
    h = h * jax.nn.sigmoid(h)
    # bf16 LHS -> single-pass bf16 MXU pipe for the second matmul.
    h = h.astype(jnp.bfloat16)
    out = jnp.dot(h, w2_ref[...], preferred_element_type=jnp.float32)
    out = out + b2_ref[...]
    o_ref[...] = out.astype(o_ref.dtype)


def _chip_info():
    """Return (vmem_capacity_bytes, multi_tensorcore) with safe fallbacks."""
    vmem_cap = None
    try:
        info = pltpu.get_tpu_info()
        cap = int(getattr(info, "vmem_capacity_bytes", 0) or 0)
        if cap > 0:
            vmem_cap = cap
    except Exception:
        vmem_cap = None

    kind = ""
    try:
        kind = str(jax.devices()[0].device_kind).lower()
    except Exception:
        pass
    multi_tc = ("v7" in kind) or ("7x" in kind)

    if vmem_cap is None:
        # v7x has 64 MiB per TensorCore; v5e / v6e have 128 MiB.
        vmem_cap = (64 << 20) if multi_tc else (128 << 20)
    if vmem_cap <= (96 << 20):
        # Small-VMEM generation (v7x-class) also has 2 TensorCores per chip.
        multi_tc = True
    return vmem_cap, multi_tc


def _pick_tile_n(Bp, E, H, itemsize_w, out_itemsize, vmem_budget, multi_tc):
    """Pick the w2 column-tile width tn (divisor of H, multiple of 128)."""
    if H % 128 != 0:
        return H                                    # tiny config: one fused block

    headroom = 2 << 20
    # x, w1, b1 (single-buffer footprint).
    resident = Bp * E * itemsize_w + E * H * itemsize_w + H * 4

    def tile_bytes(tn):                             # w2 tile + b2 tile + out tile
        return H * tn * itemsize_w + tn * 4 + Bp * tn * out_itemsize

    # Single TC (v5e/v6e): one big block is best if it fits (default 2x buffers).
    if not multi_tc and 2 * (resident + tile_bytes(H)) + headroom <= vmem_budget:
        return H

    cands = [tn for tn in range(H, 0, -128) if H % tn == 0]   # descending
    if multi_tc and len(cands) > 1:
        # Ensure >= 2 column tiles so both TensorCores share the w2 stream.
        halved = [tn for tn in cands if tn <= H // 2]
        if halved:
            cands = halved
    for tn in cands:
        # Resident operands single-buffered (pl.Buffered(1)); tiled ones 2x.
        if resident + 2 * tile_bytes(tn) + headroom <= vmem_budget:
            return tn
    return cands[-1]                                # smallest tile always safest


def prepare_time_embedding_params(w1, b1, w2, b2, *, weight_dtype=jnp.bfloat16):
    """One-time parameter preparation (do NOT call per step): bf16 weights,
    f32 2-D biases.  Store/serve params in this form to avoid a per-call cast
    (which would be its own HBM round trip on a weight-DMA-bound kernel)."""
    E, H = w1.shape
    return (w1.astype(weight_dtype),
            b1.reshape(1, H).astype(jnp.float32),
            w2.astype(weight_dtype),
            b2.reshape(1, H).astype(jnp.float32))


def time_embedding(x, w1c, b1_2d, w2c, b2_2d):
    """x: (B, n_embed).  Params as returned by prepare_time_embedding_params:
    w1c (E,4E) bf16, b1 (1,4E) f32, w2c (4E,4E) bf16, b2 (1,4E) f32."""
    B, E = x.shape
    H = 4 * E
    assert w1c.shape == (E, H) and w2c.shape == (H, H)
    assert b1_2d.shape == (1, H) and b2_2d.shape == (1, H)
    out_dtype = x.dtype
    out_itemsize = jnp.dtype(out_dtype).itemsize

    weight_dtype = w1c.dtype
    if weight_dtype == jnp.float32:
        # Fallback only: prefer pre-casting once via prepare_time_embedding_params.
        weight_dtype = jnp.bfloat16
        w1c = w1c.astype(weight_dtype)
        w2c = w2c.astype(weight_dtype)
    itemsize_w = jnp.dtype(weight_dtype).itemsize

    # Pad batch to 16 sublanes: fully packed bf16 activation tiles (and the
    # f32 output block at 16 rows is also unmasked).  Slice back at the end.
    Bp = ((B + 15) // 16) * 16
    x_p = x if Bp == B else jnp.pad(x, ((0, Bp - B), (0, 0)))
    x_p = x_p.astype(weight_dtype)

    vmem_cap, multi_tc = _chip_info()
    vmem_budget = vmem_cap - (4 << 20)           # headroom for Mosaic scratch
    tn = _pick_tile_n(Bp, E, H, itemsize_w, out_itemsize, vmem_budget, multi_tc)
    n_tiles = H // tn

    # Explicit VMEM limit derived from the actual footprint, capped to the chip.
    resident = Bp * E * itemsize_w + E * H * itemsize_w + H * 4
    tile = H * tn * itemsize_w + tn * 4 + Bp * tn * out_itemsize
    resident_bufs = 1 if n_tiles > 1 else 2
    need = resident_bufs * resident + 2 * tile + (4 << 20)
    vmem_limit = int(min(vmem_cap - (2 << 20), max(need, 32 << 20)))

    # Resident operands (constant index_map): single-buffer them when tiled to
    # free VMEM for a larger w2 tile; keep defaults on the single-block path.
    if n_tiles > 1:
        def _resident_spec(shape):
            return pl.BlockSpec(shape, lambda j: (0, 0),
                                pipeline_mode=pl.Buffered(1))
    else:
        def _resident_spec(shape):
            return pl.BlockSpec(shape, lambda j: (0, 0))

    cost = pl.CostEstimate(
        flops=2 * Bp * E * H + 2 * Bp * H * H,
        transcendentals=Bp * H,
        bytes_accessed=(Bp * E * itemsize_w + E * H * itemsize_w + H * 4
                        + H * H * itemsize_w + H * 4 + Bp * H * out_itemsize),
    )

    out_p = pl.pallas_call(
        time_embedding_kernel,
        out_shape=jax.ShapeDtypeStruct((Bp, H), out_dtype),
        grid=(n_tiles,),
        in_specs=[
            _resident_spec((Bp, E)),                   # x       (resident)
            _resident_spec((E, H)),                    # w1      (resident)
            _resident_spec((1, H)),                    # b1      (resident)
            pl.BlockSpec((H, tn), lambda j: (0, j)),   # w2 cols (tiled over N)
            pl.BlockSpec((1, tn), lambda j: (0, j)),   # b2 cols
        ],
        out_specs=pl.BlockSpec((Bp, tn), lambda j: (0, j)),
        compiler_params=pltpu.CompilerParams(
            dimension_semantics=("parallel",),
            vmem_limit_bytes=vmem_limit,
        ),
        cost_estimate=cost,
    )(x_p, w1c, b1_2d, w2c, b2_2d)

    return out_p[:B]


def time_embedding_ref(x, w1, b1, w2, b2):
    """Pure-JAX f32 reference for correctness checking."""
    h = x @ w1 + b1
    h = h * jax.nn.sigmoid(h)
    return h @ w2 + b2


if __name__ == "__main__":
    # Small shapes consistent with the module: batch=2, n_embed=32 -> hidden 128.
    B, E = 2, 32
    H = 4 * E

    key = jax.random.PRNGKey(0)
    kx, kw1, kb1, kw2, kb2 = jax.random.split(key, 5)

    x = jax.random.normal(kx, (B, E), dtype=jnp.float32)
    # Deterministic synthetic parameters (nn.Linear-ish scale).
    w1 = jax.random.normal(kw1, (E, H), dtype=jnp.float32) * (1.0 / jnp.sqrt(E))
    b1 = jax.random.normal(kb1, (H,), dtype=jnp.float32) * 0.01
    w2 = jax.random.normal(kw2, (H, H), dtype=jnp.float32) * (1.0 / jnp.sqrt(H))
    b2 = jax.random.normal(kb2, (H,), dtype=jnp.float32) * 0.01

    # One-time param preparation (bf16 weights) -- hoisted out of the call path.
    params = prepare_time_embedding_params(w1, b1, w2, b2)

    out = time_embedding(x, *params)
    out = jax.block_until_ready(out)

    ref = time_embedding_ref(x, w1, b1, w2, b2)
    assert out.shape == (B, H)
    # Tolerance loosened vs f32 reference because weights/activations run in
    # bf16 on the MXU (accumulation stays f32).
    assert jnp.allclose(out, ref, atol=5e-2, rtol=5e-2), "mismatch vs reference"

    print("KERNEL_OK")
</pallas_src>

<mosaic_0001>
module attributes {stable_mosaic.version = 11 : i64} {
  func.func @time_embedding_kernel(%arg0: i32, %arg1: memref<16x32xbf16, #tpu.memory_space<vmem>>, %arg2: memref<32x128xbf16, #tpu.memory_space<vmem>>, %arg3: memref<1x128xf32, #tpu.memory_space<vmem>>, %arg4: memref<128x128xbf16, #tpu.memory_space<vmem>>, %arg5: memref<1x128xf32, #tpu.memory_space<vmem>>, %arg6: memref<16x128xf32, #tpu.memory_space<vmem>>) attributes {dimension_semantics = [#tpu.dimension_semantics<parallel>], iteration_bounds = array<i64: 1>, scalar_prefetch = 0 : i64, scratch_operands = 0 : i64, tpu.core_type = #tpu.core_type<tc>, window_params = [{pipeline_mode = #tpu.pipeline_mode<synchronous>, transform_indices = @transform_0, window_bounds = array<i64: 16, 32>}, {pipeline_mode = #tpu.pipeline_mode<synchronous>, transform_indices = @transform_1, window_bounds = array<i64: 32, 128>}, {pipeline_mode = #tpu.pipeline_mode<synchronous>, transform_indices = @transform_2, window_bounds = array<i64: 1, 128>}, {transform_indices = @transform_3, window_bounds = array<i64: 128, 128>}, {transform_indices = @transform_4, window_bounds = array<i64: 1, 128>}, {transform_indices = @transform_5, window_bounds = array<i64: 16, 128>}]} {
    %c0 = arith.constant 0 : index
    %c0_0 = arith.constant 0 : index
    %0 = vector.load %arg1[%c0, %c0_0] : memref<16x32xbf16, #tpu.memory_space<vmem>>, vector<16x32xbf16>
    %c0_1 = arith.constant 0 : index
    %c0_2 = arith.constant 0 : index
    %1 = vector.load %arg2[%c0_1, %c0_2] : memref<32x128xbf16, #tpu.memory_space<vmem>>, vector<32x128xbf16>
    %cst = arith.constant dense<0.000000e+00> : vector<16x128xf32>
    %2 = tpu.matmul %0, %1, %cst {dimension_numbers = #tpu.dot_dimension_numbers<[1], [0], [0], [1], [0, 0, 1, 1], [], []>} : vector<16x32xbf16>, vector<32x128xbf16>, vector<16x128xf32> -> vector<16x128xf32>
    %c0_3 = arith.constant 0 : index
    %c0_4 = arith.constant 0 : index
    %3 = vector.load %arg3[%c0_3, %c0_4] : memref<1x128xf32, #tpu.memory_space<vmem>>, vector<1x128xf32>
    %4 = vector.broadcast %3 : vector<1x128xf32> to vector<16x128xf32>
    %5 = arith.addf %2, %4 : vector<16x128xf32>
    %6 = arith.negf %5 : vector<16x128xf32>
    %7 = math.exp %6 : vector<16x128xf32>
    %cst_5 = arith.constant 1.000000e+00 : f32
    %8 = vector.broadcast %cst_5 : f32 to vector<16x128xf32>
    %9 = arith.addf %8, %7 : vector<16x128xf32>
    %10 = arith.divf %8, %9 : vector<16x128xf32>
    %11 = arith.mulf %5, %10 : vector<16x128xf32>
    %12 = arith.truncf %11 : vector<16x128xf32> to vector<16x128xbf16>
    %c0_6 = arith.constant 0 : index
    %c0_7 = arith.constant 0 : index
    %13 = vector.load %arg4[%c0_6, %c0_7] : memref<128x128xbf16, #tpu.memory_space<vmem>>, vector<128x128xbf16>
    %cst_8 = arith.constant dense<0.000000e+00> : vector<16x128xf32>
    %14 = tpu.matmul %12, %13, %cst_8 {dimension_numbers = #tpu.dot_dimension_numbers<[1], [0], [0], [1], [0, 0, 1, 1], [], []>} : vector<16x128xbf16>, vector<128x128xbf16>, vector<16x128xf32> -> vector<16x128xf32>
    %c0_9 = arith.constant 0 : index
    %c0_10 = arith.constant 0 : index
    %15 = vector.load %arg5[%c0_9, %c0_10] : memref<1x128xf32, #tpu.memory_space<vmem>>, vector<1x128xf32>
    %16 = vector.broadcast %15 : vector<1x128xf32> to vector<16x128xf32>
    %17 = arith.addf %14, %16 : vector<16x128xf32>
    %c0_11 = arith.constant 0 : index
    %c0_12 = arith.constant 0 : index
    %18 = vector.load %arg6[%c0_11, %c0_12] : memref<16x128xf32, #tpu.memory_space<vmem>>, vector<16x128xf32>
    tpu.vector_store %arg6[%c0_11, %c0_12], %17 {strides = array<i32>} : memref<16x128xf32, #tpu.memory_space<vmem>>, vector<16x128xf32>,
    return
  }
  func.func @transform_0(%arg0: i32) -> (i32, i32) {
    %c0_i32 = arith.constant 0 : i32
    %c0_i32_0 = arith.constant 0 : i32
    %c0_i32_1 = arith.constant 0 : i32
    return %c0_i32, %c0_i32_0 : i32, i32
  }
  func.func @transform_1(%arg0: i32) -> (i32, i32) {
    %c0_i32 = arith.constant 0 : i32
    %c0_i32_0 = arith.constant 0 : i32
    %c0_i32_1 = arith.constant 0 : i32
    return %c0_i32, %c0_i32_0 : i32, i32
  }
  func.func @transform_2(%arg0: i32) -> (i32, i32) {
    %c0_i32 = arith.constant 0 : i32
    %c0_i32_0 = arith.constant 0 : i32
    %c0_i32_1 = arith.constant 0 : i32
    return %c0_i32, %c0_i32_0 : i32, i32
  }
  func.func @transform_3(%arg0: i32) -> (i32, i32) {
    %c0_i32 = arith.constant 0 : i32
    %c0_i32_0 = arith.constant 0 : i32
    return %c0_i32, %arg0 : i32, i32
  }
  func.func @transform_4(%arg0: i32) -> (i32, i32) {
    %c0_i32 = arith.constant 0 : i32
    %c0_i32_0 = arith.constant 0 : i32
    return %c0_i32, %arg0 : i32, i32
  }
  func.func @transform_5(%arg0: i32) -> (i32, i32) {
    %c0_i32 = arith.constant 0 : i32
    %c0_i32_0 = arith.constant 0 : i32
    return %c0_i32, %arg0 : i32, i32
  }
}

</mosaic_0001>

<bundles_post_ra>
// kernel: tpu_custom_call.1
= control target key start
LH: loop header
LB: loop body
LE: loop exit
PB: predicated region body
PF: predicated region fallthrough
CT: control target
= control target key end

     0   :  { %10 = vsyncpa [#allocation3], 0  ;;  %s514_s0 = inlined_call_operand.hbm [shape: bf16[16,32], index: 0, kind: input, shape index: {}]   ;;  %s515_s1 = inlined_call_operand.hbm [shape: bf16[32,128], index: 1, kind: input, shape index: {}]   ;;  %s516_s2 = inlined_call_operand.vmem [shape: f32[1,128], index: 2, kind: input, shape index: {}]   ;;  %s517_s3 = inlined_call_operand.hbm [shape: bf16[128,128], index: 3, kind: input, shape index: {}]   ;;  %s518_s4 = inlined_call_operand.vmem [shape: f32[1,128], index: 4, kind: input, shape index: {}]   ;;  %s519_s5 = inlined_call_operand.hbm [shape: f32[16,128], index: 5, kind: output, shape index: {}]  }
   0x1   :  { %11 = vsyncpa [#allocation6], 0 }
   0x2   :  { %12 = vsyncpa [#allocation4], 0  ;;  %s456_s18 = smov [#allocation5]   ;;  %s457_s20 = smov [#allocation2]  }
   0x3   :  { %s30_s19 = sshll.u32 %s456_s18, 4  ;;  %s18_s21 = sshll.u32 %s457_s20, 4  ;;  %s31_s19 = int_to_ptr.vmem [resolvable:$true] %s30_s19  ;;  %s19_s21 = int_to_ptr.vmem [resolvable:$true] %s18_s21 }
   0x4   :  { %s378_s22 = scalar_lea.vmem %s31_s19, 256  ;;  %p383_p1 = scmp.lt.s32.totalorder %s31_s19, %s31_s19 }
   0x5   :  { %p379_p0 = scmp.ne.s32.totalorder %s31_s19, %s378_s22  ;;  %p384_p2 = scmp.lt.s32.totalorder %s378_s22, %s378_s22 }
   0x7   :  { %p385_p3 = por %p384_p2, %p383_p1 }
   0x9   :  { %p386_p4 = pnand %p385_p3, %p379_p0 }
   0xb   :  { %389 = shalt.err (!%p386_p4)
}
   0xc   :  { %s458_s23 = smov 64   ;;  %s459_s24 = smov 4  }
   0xd   :  { %36 = dma.hbm_to_vmem [thread:$0]  %s515_s1, 256, %s31_s19, [#allocation6], %s458_s23, %s458_s23, %s459_s24  }
   0xe   :  { %s398_s27 = scalar_lea.vmem %s19_s21, 128  ;;  %p403_p6 = scmp.lt.s32.totalorder %s19_s21, %s19_s21 }
   0xf   :  { %p399_p5 = scmp.ne.s32.totalorder %s19_s21, %s398_s27  ;;  %p404_p7 = scmp.lt.s32.totalorder %s398_s27, %s398_s27 }
  0x11   :  { %p405_p8 = por %p404_p7, %p403_p6 }
  0x13   :  { %p406_p9 = pnand %p405_p8, %p399_p5 }
  0x15   :  { %409 = shalt.err (!%p406_p9)
}
  0x16   :  { %24 = dma.hbm_to_vmem [thread:$0]  %s514_s0, 128, %s19_s21, [#allocation3], %s458_s23, %s458_s23, %s459_s24  }
  0x17   :  { %s460_s30 = smov [#allocation7]  }
  0x18   :  { %s44_s6 = sshll.u32 %s460_s30, 4  ;;  %s45_s6 = int_to_ptr.vmem [resolvable:$true] %s44_s6 }
  0x19   :  { %s418_s7 = scalar_lea.vmem %s45_s6, 1024  ;;  %p423_p11 = scmp.lt.s32.totalorder %s45_s6, %s45_s6 }
  0x1a   :  { %p419_p10 = scmp.ne.s32.totalorder %s45_s6, %s418_s7  ;;  %p424_p12 = scmp.lt.s32.totalorder %s418_s7, %s418_s7 }
  0x1c   :  { %p425_p13 = por %p424_p12, %p423_p11 }
  0x1e   :  { %p426_p0 = pnand %p425_p13, %p419_p10 }
  0x20   :  { %429 = shalt.err (!%p426_p0)
}
  0x21   :  { %50 = dma.hbm_to_vmem [thread:$0]  %s517_s3, 1024, %s45_s6, [#allocation6], %s458_s23, %s458_s23, %s459_s24  }
  0x22   :  { %450 = dma.done.wait [#allocation3], 128  }
  0x23   :  { %451 = vsyncadd [#allocation3], 4294967168 }
  0x24   :  { %452 = dma.done.wait [#allocation6], 1280  }
  0x25   :  { %453 = vsyncadd [#allocation6], 4294966016  ;;  %v461_v0 = vmov 0.0   ;;  %vm462_vm0 = vmmov 0   ;;  %v351_v1 = vld [vmem:[#allocation5 + $0x8] sm:$0xff]   ;;  %v352_v2 = vld [vmem:[#allocation5] sm:$0xff]  }
  0x26   :  { %313 = vmatprep.subr.bf16.mxu0 %v461_v0  ;;  %317 = vmatprep.mubr.msk.bf16.mxu0 %vm462_vm0, %v461_v0  ;;  %v353_v3 = vld [vmem:[#allocation2] sm:$0xff]   ;;  %vm93_vm1 = vcmask 261120   ;;  %v354_v4 = vld [vmem:[#allocation7 + $0x38] sm:$0xff]   ;;  %v355_v5 = vld [vmem:[#allocation7 + $0x30] sm:$0xff]   ;;  %s463_s10 = smov [#allocation8]  }
  0x27   :  { %321 = vmatprep.subr.bf16.mxu1 %v461_v0  ;;  %337 = vmatprep.mubr.msk.bf16.mxu1 %vm462_vm0, %v461_v0  ;;  %v356_v6 = vld [vmem:[#allocation7 + $0x28] sm:$0xff]   ;;  %v357_v7 = vld [vmem:[#allocation7 + $0x20] sm:$0xff]   ;;  %v358_v8 = vld [vmem:[#allocation7 + $0x18] sm:$0xff]   ;;  %s272_s11 = sshll.u32 %s463_s10, 4  ;;  %s273_s11 = int_to_ptr.vmem [resolvable:$true] %s272_s11 }
  0x28   :  { %314 = vmatpush3.bf16.msra.mxu0 %v351_v1  ;;  %322 = vmatpush3.bf16.msra.mxu1 %v354_v4  ;;  %v359_v9 = vld [vmem:[#allocation7 + $0x10] sm:$0xff]   ;;  %v360_v10 = vld [vmem:[#allocation7 + $0x8] sm:$0xff]   ;;  %v361_v11 = vld [vmem:[#allocation7] sm:$0xff]   ;;  %s430_s12 = scalar_lea.vmem %s273_s11, 256  ;;  %p435_p2 = scmp.lt.s32.totalorder %s273_s11, %s273_s11 }
  0x29   :  { %315 = vmatprep.subr.bf16.mxu0 %v461_v0  ;;  %323 = vmatprep.subr.bf16.mxu1 %v461_v0  ;;  %v285_v12 = vld [vmem:[%s516_s2] ss:$0 sm:$0xff]  ;;  %p431_p1 = scmp.ne.s32.totalorder %s273_s11, %s430_s12  ;;  %p436_p3 = scmp.lt.s32.totalorder %s430_s12, %s430_s12 }
  0x2a   :  { %v292_v30 = vld [vmem:[%s518_s4] ss:$0 sm:$0xff] }
  0x2b   :  { %p437_p4 = por %p436_p3, %p435_p2 }
  0x2c   :  { %316 = vmatpush3.bf16.msra.mxu0 %v352_v2  ;;  %324 = vmatpush3.bf16.msra.mxu1 %v355_v5 }
  0x2d   :  { %325 = vmatprep.subr.bf16.mxu1 %v461_v0  ;;  %p438_p5 = pnand %p437_p4, %p431_p1 }
  0x2f   :  { %318 = vmatmul.mubr.msk.bf16.vlgmr.msra.gmra.mxu0 %vm93_vm1, %v353_v3 }
  0x30   :  { %326 = vmatpush3.bf16.msra.mxu1 %v356_v6 }
  0x31   :  { %327 = vmatprep.subr.bf16.mxu1 %v461_v0 }
  0x34   :  { %328 = vmatpush3.bf16.msra.mxu1 %v357_v7 }
  0x35   :  { %329 = vmatprep.subr.bf16.mxu1 %v461_v0 }
  0x38   :  { %330 = vmatpush3.bf16.msra.mxu1 %v358_v8 }
  0x39   :  { %331 = vmatprep.subr.bf16.mxu1 %v461_v0 }
  0x3c   :  { %332 = vmatpush3.bf16.msra.mxu1 %v359_v9 }
  0x3d   :  { %333 = vmatprep.subr.bf16.mxu1 %v461_v0 }
  0x40   :  { %334 = vmatpush3.bf16.msra.mxu1 %v360_v10 }
  0x41   :  { %335 = vmatprep.subr.bf16.mxu1 %v461_v0 }
  0x44   :  { %336 = vmatpush3.bf16.msra.mxu1 %v361_v11 }
  0xef   :  { %v131_v13 = vpop.f32.mrf.mxu0 }
  0xf0   :  { %v132_v14 = vadd.f32 %v285_v12, %v131_v13 }
  0xf1   :  { %v319_v15 = vpop.f32.mrf.mxu0 }
  0xf2   :  { %v290_v16 = vmul.f32 -1.442695, %v132_v14 }
  0xf3   :  { %v134_v17 = vpop.f32.mrf.mxu0 }
  0xf4   :  { %362 = vpow2.f32 %v290_v16  ;;  %v135_v18 = vadd.f32 %v285_v12, %v134_v17 }
  0xf5   :  { %v320_v19 = vpop.f32.mrf.mxu0 }
  0xf6   :  { %v291_v20 = vmul.f32 -1.442695, %v135_v18 }
  0xf8   :  { %364 = vpow2.f32 %v291_v20 }
 0x101   :  { %v363_v21 = vpop.eup %362 }
 0x102   :  { %v144_v22 = vadd.f32 1.0, %v363_v21 }
 0x104   :  { %366 = vrcp.f32 %v144_v22 }
 0x105   :  { %v365_v23 = vpop.eup %364 }
 0x106   :  { %v145_v24 = vadd.f32 1.0, %v365_v23 }
 0x108   :  { %368 = vrcp.f32 %v145_v24 }
 0x111   :  { %v367_v25 = vpop.eup %366 }
 0x112   :  { %v150_v27 = vmul.f32 %v367_v25, %v132_v14 }
 0x115   :  { %v369_v26 = vpop.eup %368 }
 0x116   :  { %v151_v28 = vmul.f32 %v369_v26, %v135_v18 }
 0x118   :  { %v152_v29 = vpack.c.bf16 %v151_v28, %v150_v27 }
 0x11a   :  { %338 = vmatmul.mubr.bf16.vlgmr.msra.gmra.mxu1 %v152_v29 }
 0x1da   :  { %v258_v31 = vpop.f32.mrf.mxu1 }
 0x1db   :  { %v259_v32 = vadd.f32 %v292_v30, %v258_v31 }
 0x1dc   :  { %v339_v33 = vpop.f32.mrf.mxu1 }
 0x1dd   :  { %265 = vst [vmem:[#allocation8] sm:$0xff] %v259_v32 }
 0x1de   :  { %v261_v34 = vpop.f32.mrf.mxu1 }
 0x1df   :  { %v262_v35 = vadd.f32 %v292_v30, %v261_v34 }
 0x1e0   :  { %v340_v36 = vpop.f32.mrf.mxu1 }
 0x1e1   :  { %266 = vst [vmem:[#allocation8 + $0x8] sm:$0xff] %v262_v35 }
 0x1e2   :  { %441 = shalt.err (!%p438_p5)
}
 0x1e3   :  { %s464_s13 = smov 128   ;;  %s465_s4 = smov 8  }
 0x1e4   :  { %278 = dma.vmem_to_hbm [thread:$0]  %s273_s11, 256, %s519_s5, [#allocation4], %s464_s13, %s464_s13, %s465_s4  }
 0x1e5   :  { %454 = dma.done.wait [#allocation4], 256  }
 0x1e6   :  { %455 = vsyncadd [#allocation4], 4294967040 }
 0x1e7   :  { %282 = vsyncpa [#allocation3], 1 }
 0x1e8   :  { %283 = vsyncpa [#allocation6], 1 }
 0x1e9   :  { %284 = vsyncpa [#allocation4], 1 }

</bundles_post_ra>
